<compile_context>
chip_gen: v7x
topology: tpu7x:2x2x1
jax: 0.10.0
libtpu: 0.0.40
codegen_flags: <defaults>
</compile_context>

<pallas_src>
import math

import jax
import jax.numpy as jnp
from jax.experimental import pallas as pl
from jax.experimental.pallas import tpu as pltpu

HIDDEN = 64
OUT = 1
_LANE = 128
_SUBLANE = 8


def _mlp_kernel(x_ref, w1_ref, b1_ref, w2_ref, b2_ref, o_ref):
    # x: (TB, F), w1: (F, 64), b1: (1, 64), w2: (64, 1), b2: (1, 1), o: (1, TB)
    x = x_ref[...]
    h = jnp.dot(x, w1_ref[...], preferred_element_type=jnp.float32) + b1_ref[...]
    h = jnp.maximum(h, 0.0)  # ReLU
    # fc2 (out_features == 1): put the batch on lanes via an XLU transpose,
    # then VPU multiply + sublane reduce.  Keeps the sigmoid epilogue and the
    # output store lane-dense (unmasked stores) instead of a (TB, 1) column.
    ht = h.T                                                        # (64, TB)
    z = jnp.sum(ht * w2_ref[...], axis=0, keepdims=True) + b2_ref[...]  # (1, TB)
    o_ref[...] = 1.0 / (1.0 + jnp.exp(-z))  # Sigmoid (exp on EUP), exact parity


def _choose_tile_rows(B, F, max_tile_rows=None):
    """Rows per tile, sized by bytes with lane-padded F, multiple of 256
    (or the full batch / sublane-aligned when capped)."""
    f_pad = max(_LANE, -(-F // _LANE) * _LANE)      # lane-padded VMEM row width
    budget = 4 * 1024 * 1024                        # double-buffered x tile bytes
    tb = max(256, (budget // (2 * f_pad * 4)) // 256 * 256)
    if B > 512:
        # Keep at least 2 grid steps so a v7x megacore can split the batch axis.
        half = -(-(-(-B // 2)) // 256) * 256        # round_up(ceil(B/2), 256)
        tb = min(tb, max(256, half))
    if max_tile_rows is not None:
        tb = min(tb, max(_SUBLANE, (max_tile_rows // _SUBLANE) * _SUBLANE))
    if tb >= B:
        return B                                    # single full-extent block
    return max(_SUBLANE, (tb // _SUBLANE) * _SUBLANE)


def _vmem_limit_bytes(TB, F):
    """Conservative scoped-VMEM request (lane/sublane padding included)."""
    f_pad = max(_LANE, -(-F // _LANE) * _LANE)
    f_sub = max(_SUBLANE, -(-F // _SUBLANE) * _SUBLANE)
    tb_sub = max(_SUBLANE, -(-TB // _SUBLANE) * _SUBLANE)
    tb_lane = max(_LANE, -(-TB // _LANE) * _LANE)
    x_bytes = 2 * tb_sub * f_pad * 4          # double-buffered streamed x tile
    w_bytes = 2 * f_sub * _LANE * 4           # resident w1 (default double-buffered)
    o_bytes = 2 * _SUBLANE * tb_lane * 4      # double-buffered (1, TB) output row
    misc = 1 * 1024 * 1024                    # biases, w2, relayout scratch slack
    est = x_bytes + w_bytes + o_bytes + misc
    # Explicit limit (v5e scoped default is only 16 MiB); stay under v7x's
    # 64 MiB-per-TensorCore physical VMEM.
    return int(min(64 * 1024 * 1024, max(32 * 1024 * 1024, 2 * est)))


def employee_classifier_forward(x, w1, b1, w2, b2, *, max_tile_rows=None):
    """Forward pass. x: (B, F) f32. w1/b1/w2/b2 in PyTorch (out, in) convention."""
    B, F = x.shape
    x = jnp.asarray(x, jnp.float32)
    # PyTorch nn.Linear stores weights (out, in); transpose fc1 to (in, out).
    w1_t = jnp.asarray(w1, jnp.float32).T                        # (F, 64)
    b1_2d = jnp.asarray(b1, jnp.float32).reshape(1, HIDDEN)      # (1, 64)
    w2_col = jnp.asarray(w2, jnp.float32).reshape(HIDDEN, OUT)   # (64, 1)
    b2_2d = jnp.asarray(b2, jnp.float32).reshape(1, OUT)         # (1, 1)

    TB = _choose_tile_rows(B, F, max_tile_rows)
    num_tiles = -(-B // TB)  # ragged last block handled by Pallas; no jnp.pad

    out = pl.pallas_call(
        _mlp_kernel,
        out_shape=jax.ShapeDtypeStruct((num_tiles, 1, TB), jnp.float32),
        grid_spec=pltpu.PrefetchScalarGridSpec(
            num_scalar_prefetch=0,
            grid=(num_tiles,),
            in_specs=[
                # Streamed input: new batch tile per grid step.
                pl.BlockSpec((TB, F), lambda i: (i, 0)),
                # Weights / biases: constant block index -> resident in VMEM.
                pl.BlockSpec((F, HIDDEN), lambda i: (0, 0)),
                pl.BlockSpec((1, HIDDEN), lambda i: (0, 0)),
                pl.BlockSpec((HIDDEN, OUT), lambda i: (0, 0)),
                pl.BlockSpec((1, OUT), lambda i: (0, 0)),
            ],
            # Lane-dense per-tile output row; leading tile dim squeezed.
            out_specs=pl.BlockSpec((None, 1, TB), lambda i: (i, 0, 0)),
        ),
        compiler_params=pltpu.CompilerParams(
            dimension_semantics=("parallel",),
            vmem_limit_bytes=_vmem_limit_bytes(TB, F),
        ),
    )(x, w1_t, b1_2d, w2_col, b2_2d)

    # (num_tiles, 1, TB) row-major flatten is exactly batch order; drop the
    # garbage rows of the ragged last tile and restore the (B, 1) shape.
    return out.reshape(-1)[:B].reshape(B, OUT)


def init_params(key, input_size):
    """Deterministic init mimicking PyTorch nn.Linear default (uniform +/- 1/sqrt(fan_in))."""
    k1, k2, k3, k4 = jax.random.split(key, 4)
    bound1 = 1.0 / math.sqrt(input_size)
    bound2 = 1.0 / math.sqrt(HIDDEN)
    w1 = jax.random.uniform(k1, (HIDDEN, input_size), jnp.float32, -bound1, bound1)
    b1 = jax.random.uniform(k2, (HIDDEN,), jnp.float32, -bound1, bound1)
    w2 = jax.random.uniform(k3, (OUT, HIDDEN), jnp.float32, -bound2, bound2)
    b2 = jax.random.uniform(k4, (OUT,), jnp.float32, -bound2, bound2)
    return w1, b1, w2, b2


def _reference(x, w1, b1, w2, b2):
    return jax.nn.sigmoid(jnp.maximum(x @ w1.T + b1, 0.0) @ w2.T + b2)


if __name__ == "__main__":
    key = jax.random.PRNGKey(0)
    kx, kp, kx2 = jax.random.split(key, 3)

    # Primary small-shape check (single full-extent tile).
    batch = 8
    input_size = 32
    x = jax.random.normal(kx, (batch, input_size), jnp.float32)
    w1, b1, w2, b2 = init_params(kp, input_size)

    out = employee_classifier_forward(x, w1, b1, w2, b2)
    out = jax.block_until_ready(out)
    ref = _reference(x, w1, b1, w2, b2)
    assert out.shape == (batch, 1)
    assert jnp.allclose(out, ref, atol=1e-5, rtol=1e-5)

    # Secondary check: multi-tile grid, ragged (un-padded) last block, and the
    # lane-dense (1, 128) output path.
    batch2 = 200
    x2 = jax.random.normal(kx2, (batch2, input_size), jnp.float32)
    out2 = employee_classifier_forward(x2, w1, b1, w2, b2, max_tile_rows=128)
    out2 = jax.block_until_ready(out2)
    ref2 = _reference(x2, w1, b1, w2, b2)
    assert out2.shape == (batch2, 1)
    assert jnp.allclose(out2, ref2, atol=1e-5, rtol=1e-5)

    print("KERNEL_OK")
</pallas_src>

<mosaic_0001>
module attributes {stable_mosaic.version = 11 : i64} {
  func.func @_mlp_kernel(%arg0: i32, %arg1: memref<8x32xf32, #tpu.memory_space<vmem>>, %arg2: memref<32x64xf32, #tpu.memory_space<vmem>>, %arg3: memref<1x64xf32, #tpu.memory_space<vmem>>, %arg4: memref<64x1xf32, #tpu.memory_space<vmem>>, %arg5: memref<1x1xf32, #tpu.memory_space<vmem>>, %arg6: memref<1x1x8xf32, #tpu.memory_space<vmem>>) attributes {dimension_semantics = [#tpu.dimension_semantics<parallel>], iteration_bounds = array<i64: 1>, scalar_prefetch = 0 : i64, scratch_operands = 0 : i64, tpu.core_type = #tpu.core_type<tc>, window_params = [{transform_indices = @transform_0, window_bounds = array<i64: 8, 32>}, {pipeline_mode = #tpu.pipeline_mode<synchronous>, transform_indices = @transform_1, window_bounds = array<i64: 32, 64>}, {pipeline_mode = #tpu.pipeline_mode<synchronous>, transform_indices = @transform_2, window_bounds = array<i64: 1, 64>}, {pipeline_mode = #tpu.pipeline_mode<synchronous>, transform_indices = @transform_3, window_bounds = array<i64: 64, 1>}, {pipeline_mode = #tpu.pipeline_mode<synchronous>, transform_indices = @transform_4, window_bounds = array<i64: 1, 1>}, {transform_indices = @transform_5, window_bounds = array<i64: 1, 1, 8>}]} {
    %c0 = arith.constant 0 : index
    %c0_0 = arith.constant 0 : index
    %0 = vector.load %arg1[%c0, %c0_0] : memref<8x32xf32, #tpu.memory_space<vmem>>, vector<8x32xf32>
    %c0_1 = arith.constant 0 : index
    %c0_2 = arith.constant 0 : index
    %1 = vector.load %arg2[%c0_1, %c0_2] : memref<32x64xf32, #tpu.memory_space<vmem>>, vector<32x64xf32>
    %cst = arith.constant dense<0.000000e+00> : vector<8x64xf32>
    %2 = tpu.matmul %0, %1, %cst {dimension_numbers = #tpu.dot_dimension_numbers<[1], [0], [0], [1], [0, 0, 1, 1], [], []>} : vector<8x32xf32>, vector<32x64xf32>, vector<8x64xf32> -> vector<8x64xf32>
    %c0_3 = arith.constant 0 : index
    %c0_4 = arith.constant 0 : index
    %3 = vector.load %arg3[%c0_3, %c0_4] : memref<1x64xf32, #tpu.memory_space<vmem>>, vector<1x64xf32>
    %4 = vector.broadcast %3 : vector<1x64xf32> to vector<8x64xf32>
    %5 = arith.addf %2, %4 : vector<8x64xf32>
    %cst_5 = arith.constant 0.000000e+00 : f32
    %6 = vector.broadcast %cst_5 : f32 to vector<8x64xf32>
    %7 = arith.maximumf %5, %6 : vector<8x64xf32>
    %8 = tpu.transpose %7, [1, 0] : vector<8x64xf32> -> vector<64x8xf32>
    %c0_6 = arith.constant 0 : index
    %c0_7 = arith.constant 0 : index
    %9 = vector.load %arg4[%c0_6, %c0_7] : memref<64x1xf32, #tpu.memory_space<vmem>>, vector<64x1xf32>
    %10 = vector.broadcast %9 : vector<64x1xf32> to vector<64x8xf32>
    %11 = arith.mulf %8, %10 : vector<64x8xf32>
    %cst_8 = arith.constant dense<0.000000e+00> : vector<8xf32>
    %12 = vector.multi_reduction <add>, %11, %cst_8 [0] : vector<64x8xf32> to vector<8xf32>
    %13 = vector.shape_cast %12 : vector<8xf32> to vector<1x8xf32>
    %c0_9 = arith.constant 0 : index
    %c0_10 = arith.constant 0 : index
    %14 = vector.load %arg5[%c0_9, %c0_10] : memref<1x1xf32, #tpu.memory_space<vmem>>, vector<1x1xf32>
    %15 = vector.broadcast %14 : vector<1x1xf32> to vector<1x8xf32>
    %16 = arith.addf %13, %15 : vector<1x8xf32>
    %cst_11 = arith.constant 0.000000e+00 : f32
    %17 = vector.broadcast %cst_11 : f32 to vector<1x8xf32>
    %18 = arith.subf %17, %16 : vector<1x8xf32>
    %19 = math.exp %18 : vector<1x8xf32>
    %cst_12 = arith.constant 1.000000e+00 : f32
    %20 = vector.broadcast %cst_12 : f32 to vector<1x8xf32>
    %21 = arith.addf %20, %19 : vector<1x8xf32>
    %cst_13 = arith.constant 1.000000e+00 : f32
    %22 = vector.broadcast %cst_13 : f32 to vector<1x8xf32>
    %23 = arith.divf %22, %21 : vector<1x8xf32>
    %c0_14 = arith.constant 0 : index
    %c0_15 = arith.constant 0 : index
    %c0_16 = arith.constant 0 : index
    %24 = vector.load %arg6[%c0_14, %c0_15, %c0_16] : memref<1x1x8xf32, #tpu.memory_space<vmem>>, vector<1x1x8xf32>
    %25 = vector.shape_cast %24 : vector<1x1x8xf32> to vector<1x8xf32>
    %26 = vector.shape_cast %23 : vector<1x8xf32> to vector<1x1x8xf32>
    tpu.vector_store %arg6[%c0_14, %c0_15, %c0_16], %26 {strides = array<i32>} : memref<1x1x8xf32, #tpu.memory_space<vmem>>, vector<1x1x8xf32>,
    return
  }
  func.func @transform_0(%arg0: i32) -> (i32, i32) {
    %c0_i32 = arith.constant 0 : i32
    %c0_i32_0 = arith.constant 0 : i32
    return %arg0, %c0_i32 : i32, i32
  }
  func.func @transform_1(%arg0: i32) -> (i32, i32) {
    %c0_i32 = arith.constant 0 : i32
    %c0_i32_0 = arith.constant 0 : i32
    %c0_i32_1 = arith.constant 0 : i32
    return %c0_i32, %c0_i32_0 : i32, i32
  }
  func.func @transform_2(%arg0: i32) -> (i32, i32) {
    %c0_i32 = arith.constant 0 : i32
    %c0_i32_0 = arith.constant 0 : i32
    %c0_i32_1 = arith.constant 0 : i32
    return %c0_i32, %c0_i32_0 : i32, i32
  }
  func.func @transform_3(%arg0: i32) -> (i32, i32) {
    %c0_i32 = arith.constant 0 : i32
    %c0_i32_0 = arith.constant 0 : i32
    %c0_i32_1 = arith.constant 0 : i32
    return %c0_i32, %c0_i32_0 : i32, i32
  }
  func.func @transform_4(%arg0: i32) -> (i32, i32) {
    %c0_i32 = arith.constant 0 : i32
    %c0_i32_0 = arith.constant 0 : i32
    %c0_i32_1 = arith.constant 0 : i32
    return %c0_i32, %c0_i32_0 : i32, i32
  }
  func.func @transform_5(%arg0: i32) -> (i32, i32, i32) {
    %c0_i32 = arith.constant 0 : i32
    %c0_i32_0 = arith.constant 0 : i32
    %c0_i32_1 = arith.constant 0 : i32
    return %arg0, %c0_i32, %c0_i32_0 : i32, i32, i32
  }
}

</mosaic_0001>

<bundles_post_ra>
// kernel: tpu_custom_call.1
= control target key start
LH: loop header
LB: loop body
LE: loop exit
PB: predicated region body
PF: predicated region fallthrough
CT: control target
= control target key end

     0   :  { %s412_s0 = inlined_call_operand.vmem [shape: f32[8,32], index: 0, kind: input, shape index: {}]   ;;  %s413_s1 = inlined_call_operand.vmem [shape: f32[32,64], index: 1, kind: input, shape index: {}]   ;;  %s414_s2 = inlined_call_operand.vmem [shape: f32[1,64], index: 2, kind: input, shape index: {}]   ;;  %s415_s3 = inlined_call_operand.vmem [shape: f32[64,1], index: 3, kind: input, shape index: {}]   ;;  %s416_s4 = inlined_call_operand.<no memory space> [shape: f32[1,1], index: 4, kind: input, shape index: {}]   ;;  %s417_s5 = inlined_call_operand.hbm [shape: f32[1,1,8], index: 5, kind: output, shape index: {}]  }
   0x1   :  { %v10_v0 = vstv %s416_s4 }
   0x2   :  { %11 = vst [vmem:[#allocation2] sm:$0x1] %v10_v0 }
   0x3   :  { %v24_v1 = vld [vmem:[%s413_s1] sm:$0xff]  ;;  %v25_v2 = vld [vmem:[%s413_s1 + $0x8] sm:$0xff]  ;;  %v26_v3 = vld [vmem:[%s413_s1 + $0x10] sm:$0xff]  ;;  %v312_v4 = vmov 0.0|0.0   ;;  %vm313_vm0 = vmmov 0   ;;  %v314_v7 = vmov 0.0  }
   0x4   :  { %271 = vmatprep.subr.bf16.mxu0 %v312_v4  ;;  %v272_v5 = vpack.c.bf16 %v25_v2, %v24_v1  ;;  %v27_v6 = vld [vmem:[%s413_s1 + $0x18] sm:$0xff]  ;;  %268 = vmatprep.mubr.msk.f32.mxu0 %vm313_vm0, %v314_v7  ;;  %v144_v8 = vld [vmem:[%s415_s3 + $0x10] sm:$0xff]  ;;  %v315_v9 = vmov 0  }
   0x5   :  { %283 = vset.pattern.permute.xlu1 %v315_v9  ;;  %282 = vset.pattern.permute.xlu0 %v315_v9  ;;  %v275_v10 = vpack.c.bf16 %v27_v6, %v26_v3 }
   0x6   :  { %273 = vmatpush3.bf16.msra.mxu0 %v272_v5  ;;  %162 = vperm.xlu1 %283, %v144_v8  }
   0x7   :  { %12 = vsyncpa [#allocation4], 0  ;;  %274 = vmatprep.subr.bf16.mxu0 %v312_v4  ;;  %v145_v11 = vld [vmem:[%s415_s3 + $0x18] sm:$0xff]  ;;  %v23_v12 = vld [vmem:[%s412_s0] sm:$0xff]  ;;  %vm35_vm1 = vcmask 261120   ;;  %vm198_vm2 = vcmask 64512   ;;  %v226_v63 = vlaneseq }
   0x8   :  { %v147_v13 = vld [vmem:[%s415_s3 + $0x28] sm:$0xff]  ;;  %v149_v14 = vld [vmem:[%s415_s3 + $0x38] sm:$0xff]  ;;  %v142_v15 = vld [vmem:[%s415_s3] sm:$0xff]  ;;  %vm237_vm3 = vcmask 57344  }
   0x9   :  { %152 = vperm.xlu0 %282, %v142_v15   ;;  %v143_v16 = vld [vmem:[%s415_s3 + $0x8] sm:$0xff]  ;;  %v146_v17 = vld [vmem:[%s415_s3 + $0x20] sm:$0xff]  ;;  %v148_v18 = vld [vmem:[%s415_s3 + $0x30] sm:$0xff]  ;;  %v227_v2 = vshrl.u32 %v226_v63, 7 }
   0xa   :  { %276 = vmatpush3.bf16.msra.mxu0 %v275_v10  ;;  %167 = vperm.xlu1 %283, %v145_v11   ;;  %v220_v19 = vld [vmem:[#allocation2] sm:$0x1] }
   0xb   :  { %v253_v20 = vld [vmem:[%s414_s2] ss:$0 sm:$0xff]  ;;  %v228_v5 = vsub.s32 0, %v227_v2  ;;  %s316_s2 = smov [#allocation3]  }
   0xc   :  { %s245_s3 = sshll.u32 %s316_s2, 4  ;;  %s246_s3 = int_to_ptr.vmem [resolvable:$true] %s245_s3 }
   0xd   :  { %269 = vmatmul.mubr.msk.f32.vlgmr.msra.gmra.mrb[0].mxu0 %vm35_vm1, %v23_v12  ;;  %157 = vperm.xlu0 %282, %v143_v16   ;;  %s288_s20 = scalar_lea.vmem %s246_s3, 16  ;;  %s292_s21 = scalar_lea.vmem %s246_s3, 32 }
   0xe   :  { %177 = vperm.xlu1 %283, %v147_v13   ;;  %p289_p0 = scmp.ne.s32.totalorder %s246_s3, %s288_s20  ;;  %p293_p1 = scmp.lt.s32.totalorder %s246_s3, %s246_s3 }
   0xf   :  { %p294_p2 = scmp.lt.s32.totalorder %s292_s21, %s288_s20 }
  0x11   :  { %172 = vperm.xlu0 %282, %v146_v17   ;;  %p295_p3 = por %p294_p2, %p293_p1 }
  0x12   :  { %187 = vperm.xlu1 %283, %v149_v14  }
  0x13   :  { %p296_p4 = pnand %p295_p3, %p289_p0 }
  0x15   :  { %182 = vperm.xlu0 %282, %v148_v18  }
  0x19   :  { %223 = vperm.xlu0 %282, %v220_v19  }
  0x85   :  { %v163_v25 = vpop.permute.xlu1 %162 }
  0x88   :  { %v153_v31 = vpop.permute.xlu0 %152 }
  0x89   :  { %v168_v26 = vpop.permute.xlu1 %167 }
  0x8c   :  { %v158_v33 = vpop.permute.xlu0 %157 }
  0x8d   :  { %v178_v27 = vpop.permute.xlu1 %177 }
  0x90   :  { %v173_v41 = vpop.permute.xlu0 %172 }
  0x91   :  { %v188_v28 = vpop.permute.xlu1 %187 }
  0x94   :  { %v183_v51 = vpop.permute.xlu0 %182 }
  0x98   :  { %v224_v7 = vpop.permute.xlu0 %223 }
  0x99   :  { %v229_v9 = vrot.slane %v224_v7, %v228_v5 }
  0xe0   :  { %v105_v21 = vpop.f32.mrb[0].mxu0 }
  0xe1   :  { %v106_v22 = vadd.f32 %v253_v20, %v105_v21  ;;  %v270_v23 = vpop.f32.mrb[1].mxu0 }
  0xe3   :  { %v109_v24 = vmax.f32 %v106_v22, 0.0 }
  0xe5   :  { %110 = vxpose.xlu1.b32.start.end [1/1] (short) (narrow) %v109_v24, 64 }
 0x165   :  { %v126_v29 = vpop.trf.xlu1 }
 0x166   :  { %v190_v36 = vmul.f32 %v153_v31, %v126_v29 }
 0x168   :  { %v199_v42 = vsel %vm198_vm2, %v190_v36, 0.0 }
 0x169   :  { %v127_v30 = vpop.trf.xlu1 }
 0x16a   :  { %v191_v35 = vmul.f32 %v158_v33, %v127_v30 }
 0x16c   :  { %v200_v39 = vsel %vm198_vm2, %v191_v35, 0.0 }
 0x16d   :  { %v128_v32 = vpop.trf.xlu1  ;;  %v201_v45 = vadd.f32 %v200_v39, %v199_v42 }
 0x16e   :  { %v192_v37 = vmul.f32 %v163_v25, %v128_v32 }
 0x170   :  { %v202_v43 = vsel %vm198_vm2, %v192_v37, 0.0 }
 0x171   :  { %v129_v34 = vpop.trf.xlu1  ;;  %v203_v49 = vadd.f32 %v202_v43, %v201_v45 }
 0x172   :  { %v193_v40 = vmul.f32 %v168_v26, %v129_v34 }
 0x174   :  { %v204_v47 = vsel %vm198_vm2, %v193_v40, 0.0 }
 0x175   :  { %v130_v38 = vpop.trf.xlu1  ;;  %v205_v52 = vadd.f32 %v204_v47, %v203_v49 }
 0x176   :  { %v194_v44 = vmul.f32 %v173_v41, %v130_v38 }
 0x178   :  { %v206_v50 = vsel %vm198_vm2, %v194_v44, 0.0 }
 0x179   :  { %v131_v46 = vpop.trf.xlu1  ;;  %v207_v56 = vadd.f32 %v206_v50, %v205_v52 }
 0x17a   :  { %v195_v48 = vmul.f32 %v178_v27, %v131_v46 }
 0x17c   :  { %v208_v54 = vsel %vm198_vm2, %v195_v48, 0.0 }
 0x17d   :  { %v132_v53 = vpop.trf.xlu1  ;;  %v209_v58 = vadd.f32 %v208_v54, %v207_v56 }
 0x17e   :  { %v196_v55 = vmul.f32 %v183_v51, %v132_v53 }
 0x180   :  { %v210_v57 = vsel %vm198_vm2, %v196_v55, 0.0 }
 0x181   :  { %v133_v59 = vpop.trf.xlu1  ;;  %v211_v61 = vadd.f32 %v210_v57, %v209_v58 }
 0x182   :  { %v197_v60 = vmul.f32 %v188_v28, %v133_v59 }
 0x184   :  { %v212_v62 = vsel %vm198_vm2, %v197_v60, 0.0 }
 0x185   :  { %v213_v0 = vadd.f32 %v212_v62, %v211_v61 }
 0x187   :  { %v214_v1 = vrot.slane %v213_v0, 4 }
 0x189   :  { %v215_v3 = vadd.f32 %v214_v1, %v213_v0 }
 0x18b   :  { %v216_v4 = vrot.slane %v215_v3, 2 }
 0x18d   :  { %v217_v6 = vadd.f32 %v216_v4, %v215_v3 }
 0x18f   :  { %v218_v8 = vrot.slane %v217_v6, 1 }
 0x191   :  { %v219_v10 = vadd.f32 %v218_v8, %v217_v6 }
 0x193   :  { %v230_v11 = vadd.f32 %v229_v9, %v219_v10 }
 0x195   :  { %v231_v12 = vsub.f32 0.0, %v230_v11 }
 0x197   :  { %v232_v13 = vmul.f32 1.442695, %v231_v12 }
 0x199   :  { %284 = vpow2.f32 %v232_v13 }
 0x1a3   :  { %v285_v14 = vpop.eup %284 }
 0x1a4   :  { %v234_v15 = vadd.f32 1.0, %v285_v14 }
 0x1a6   :  { %286 = vrcp.f32 %v234_v15 }
 0x1b0   :  { %v287_v16 = vpop.eup %286 }
 0x1b1   :  { %238 = vst.msk [vmem:[#allocation3] sm:$0x1] %vm237_vm3, %v287_v16 }
 0x1b2   :  { %299 = shalt.err (!%p296_p4)
}
 0x1b3   :  { %s300_s24 = scalar_lea.hbm %s417_s5, 16 }
 0x1b4   :  { %p301_p5 = scmp.ne.s32.totalorder %s417_s5, %s300_s24  ;;  %p304_p6 = scmp.lt.u32.totalorder %s300_s24, %s417_s5 }
 0x1b6   :  { %p306_p7 = pnand %p304_p6, %p301_p5 }
 0x1b8   :  { %309 = shalt.err (!%p306_p7)
}
 0x1b9   :  { %248 = dma.vmem_to_hbm [thread:$0]  %s246_s3, 16, %s417_s5, [#allocation4]  }
 0x1ba   :  { %310 = dma.done.wait [#allocation4], 16  }
 0x1bb   :  { %311 = vsyncadd [#allocation4], 4294967280 }
 0x1bc   :  { %252 = vsyncpa [#allocation4], 1 }

</bundles_post_ra>
